<compile_context>
chip_gen: v6e
topology: v6e:2x2x1
jax: 0.10.0
libtpu: 0.0.40
codegen_flags: <defaults>
</compile_context>

<pallas_src>
import jax
import jax.numpy as jnp
from jax.experimental import pallas as pl
from jax.experimental.pallas import tpu as pltpu


def _round_up(n, m):
    return ((n + m - 1) // m) * m


def _mlp_kernel(x_ref, w1_ref, b1_ref, w2_ref, b2_ref, o_ref):
    # x_ref: [TB, 20], w1_ref: [20, 32], b1_ref: [1, 32], w2_ref: [1, 32], b2_ref: [1, 1]
    x = x_ref[...]
    h = jnp.dot(x, w1_ref[...], preferred_element_type=jnp.float32)      # [TB, 32]  (MXU)
    h = jnp.maximum(h + b1_ref[...], 0.0)                                  # bias + ReLU (VPU)
    # Layer 2 contracted against the lane axis of h -> directly emits a lane-dense
    # [1, TB] row (no narrow [TB, 1] masked stores on writeback).
    out = jnp.einsum("ok,bk->ob", w2_ref[...], h,
                     preferred_element_type=jnp.float32)                   # [1, TB]
    o_ref[...] = (out + b2_ref[...]).astype(o_ref.dtype)


def audio_model_forward(x, w1, b1, w2, b2, *, tb=4096):
    """x: [B, 20] f32 -> [B, 1] f32 (same math as AudioModel.forward).

    Note: for tiny batches (B ~ a few rows) plain XLA fusion is cheaper than a
    custom kernel launch; this kernel targets batched inference.
    """
    B = x.shape[0]
    # Tile width = lane width of the output row, so keep it a multiple of 128;
    # shrink for small batches to avoid over-padding.
    tb = max(128, _round_up(min(tb, _round_up(B, 128)), 128))
    b_pad = _round_up(B, tb)
    if b_pad != B:
        x = jnp.pad(x, ((0, b_pad - B), (0, 0)))   # padded rows land in dropped outputs
    grid = (b_pad // tb,)

    # Constant index_map -> block unchanged across grid steps -> stays resident in VMEM.
    resident = lambda shape: pl.BlockSpec(shape, lambda i: (0,) * len(shape))

    out_row = pl.pallas_call(
        _mlp_kernel,
        out_shape=jax.ShapeDtypeStruct((1, b_pad), jnp.float32),
        grid=grid,
        in_specs=[
            pl.BlockSpec((tb, 20), lambda i: (i, 0)),   # x tile (double-buffered)
            resident(w1.shape),                         # [20, 32]
            resident(b1.shape),                         # [1, 32]
            resident(w2.shape),                         # [1, 32]
            resident(b2.shape),                         # [1, 1]
        ],
        out_specs=pl.BlockSpec((1, tb), lambda i: (0, i)),  # lane-dense output row
        compiler_params=pltpu.CompilerParams(
            dimension_semantics=("parallel",)),             # megacore / v7x 2-TC sharding
    )(x, w1, b1, w2, b2)

    # [1, B_pad] lane-dense row -> [B, 1] column (reshape of contiguous data, free).
    return out_row[0, :B].reshape(B, 1)


def init_params(key):
    """Deterministic init mirroring nn.Linear default (U[-1/sqrt(fan_in), +1/sqrt(fan_in)])."""
    k1, k2, k3, k4 = jax.random.split(key, 4)
    in1, out1 = 20, 32
    in2, out2 = 32, 1
    lim1 = 1.0 / jnp.sqrt(jnp.float32(in1))
    lim2 = 1.0 / jnp.sqrt(jnp.float32(in2))
    w1 = jax.random.uniform(k1, (in1, out1), jnp.float32, -lim1, lim1)   # stored [in, out]
    b1 = jax.random.uniform(k2, (1, out1), jnp.float32, -lim1, lim1)
    w2 = jax.random.uniform(k3, (out2, in2), jnp.float32, -lim2, lim2)   # stored [out, in]
    b2 = jax.random.uniform(k4, (out2, 1), jnp.float32, -lim2, lim2)
    return w1, b1, w2, b2


if __name__ == "__main__":
    key = jax.random.PRNGKey(0)
    kx, kp = jax.random.split(key)
    w1, b1, w2, b2 = init_params(kp)

    def ref_forward(xv):
        # Same math as the PyTorch forward.
        return jnp.maximum(xv @ w1 + b1, 0.0) @ w2.T + b2

    # Small batch consistent with the module (rows of 20-dim MFCC-style features).
    B = 2
    x = jax.random.normal(kx, (B, 20), jnp.float32)
    out = jax.block_until_ready(audio_model_forward(x, w1, b1, w2, b2))
    assert out.shape == (B, 1)
    assert jnp.allclose(out, ref_forward(x), atol=1e-4, rtol=1e-4)

    # Exercise the tiled path (grid > 1) and the ragged last tile, still small.
    B2 = 300
    x2 = jax.random.normal(jax.random.PRNGKey(1), (B2, 20), jnp.float32)
    out2 = jax.block_until_ready(audio_model_forward(x2, w1, b1, w2, b2, tb=128))
    assert out2.shape == (B2, 1)
    assert jnp.allclose(out2, ref_forward(x2), atol=1e-4, rtol=1e-4)

    # TODO(synk): extract_features/predict_deception rely on librosa audio I/O,
    # which has no Pallas equivalent; only the nn forward pass is implemented.
    print("KERNEL_OK")
</pallas_src>

<mosaic_0001>
module attributes {stable_mosaic.version = 11 : i64} {
  func.func @_mlp_kernel(%arg0: i32, %arg1: memref<128x20xf32, #tpu.memory_space<vmem>>, %arg2: memref<20x32xf32, #tpu.memory_space<vmem>>, %arg3: memref<1x32xf32, #tpu.memory_space<vmem>>, %arg4: memref<1x32xf32, #tpu.memory_space<vmem>>, %arg5: memref<1x1xf32, #tpu.memory_space<vmem>>, %arg6: memref<1x128xf32, #tpu.memory_space<vmem>>) attributes {dimension_semantics = [#tpu.dimension_semantics<parallel>], iteration_bounds = array<i64: 1>, scalar_prefetch = 0 : i64, scratch_operands = 0 : i64, tpu.core_type = #tpu.core_type<tc>, window_params = [{transform_indices = @transform_0, window_bounds = array<i64: 128, 20>}, {pipeline_mode = #tpu.pipeline_mode<synchronous>, transform_indices = @transform_1, window_bounds = array<i64: 20, 32>}, {pipeline_mode = #tpu.pipeline_mode<synchronous>, transform_indices = @transform_2, window_bounds = array<i64: 1, 32>}, {pipeline_mode = #tpu.pipeline_mode<synchronous>, transform_indices = @transform_3, window_bounds = array<i64: 1, 32>}, {pipeline_mode = #tpu.pipeline_mode<synchronous>, transform_indices = @transform_4, window_bounds = array<i64: 1, 1>}, {transform_indices = @transform_5, window_bounds = array<i64: 1, 128>}]} {
    %c0 = arith.constant 0 : index
    %c0_0 = arith.constant 0 : index
    %0 = vector.load %arg1[%c0, %c0_0] : memref<128x20xf32, #tpu.memory_space<vmem>>, vector<128x20xf32>
    %c0_1 = arith.constant 0 : index
    %c0_2 = arith.constant 0 : index
    %1 = vector.load %arg2[%c0_1, %c0_2] : memref<20x32xf32, #tpu.memory_space<vmem>>, vector<20x32xf32>
    %cst = arith.constant dense<0.000000e+00> : vector<128x32xf32>
    %2 = tpu.matmul %0, %1, %cst {dimension_numbers = #tpu.dot_dimension_numbers<[1], [0], [0], [1], [0, 0, 1, 1], [], []>} : vector<128x20xf32>, vector<20x32xf32>, vector<128x32xf32> -> vector<128x32xf32>
    %c0_3 = arith.constant 0 : index
    %c0_4 = arith.constant 0 : index
    %3 = vector.load %arg3[%c0_3, %c0_4] : memref<1x32xf32, #tpu.memory_space<vmem>>, vector<1x32xf32>
    %4 = vector.broadcast %3 : vector<1x32xf32> to vector<128x32xf32>
    %5 = arith.addf %2, %4 : vector<128x32xf32>
    %cst_5 = arith.constant 0.000000e+00 : f32
    %6 = vector.broadcast %cst_5 : f32 to vector<128x32xf32>
    %7 = arith.maximumf %5, %6 : vector<128x32xf32>
    %c0_6 = arith.constant 0 : index
    %c0_7 = arith.constant 0 : index
    %8 = vector.load %arg4[%c0_6, %c0_7] : memref<1x32xf32, #tpu.memory_space<vmem>>, vector<1x32xf32>
    "tpu.trace_start"() <{level = 10 : i32, message = "ok,bk->ob"}> : () -> ()
    %cst_8 = arith.constant dense<0.000000e+00> : vector<1x128xf32>
    %9 = tpu.matmul %8, %7, %cst_8 {dimension_numbers = #tpu.dot_dimension_numbers<[1], [1], [0], [0], [0, 0, 1, 0], [], []>} : vector<1x32xf32>, vector<128x32xf32>, vector<1x128xf32> -> vector<1x128xf32>
    "tpu.trace_stop"() : () -> ()
    %c0_9 = arith.constant 0 : index
    %c0_10 = arith.constant 0 : index
    %10 = vector.load %arg5[%c0_9, %c0_10] : memref<1x1xf32, #tpu.memory_space<vmem>>, vector<1x1xf32>
    %11 = vector.broadcast %10 : vector<1x1xf32> to vector<1x128xf32>
    %12 = arith.addf %9, %11 : vector<1x128xf32>
    %c0_11 = arith.constant 0 : index
    %c0_12 = arith.constant 0 : index
    %13 = vector.load %arg6[%c0_11, %c0_12] : memref<1x128xf32, #tpu.memory_space<vmem>>, vector<1x128xf32>
    tpu.vector_store %arg6[%c0_11, %c0_12], %12 {strides = array<i32>} : memref<1x128xf32, #tpu.memory_space<vmem>>, vector<1x128xf32>,
    return
  }
  func.func @transform_0(%arg0: i32) -> (i32, i32) {
    %c0_i32 = arith.constant 0 : i32
    %c0_i32_0 = arith.constant 0 : i32
    return %arg0, %c0_i32 : i32, i32
  }
  func.func @transform_1(%arg0: i32) -> (i32, i32) {
    %c0_i32 = arith.constant 0 : i32
    %c0_i32_0 = arith.constant 0 : i32
    %c0_i32_1 = arith.constant 0 : i32
    return %c0_i32, %c0_i32_0 : i32, i32
  }
  func.func @transform_2(%arg0: i32) -> (i32, i32) {
    %c0_i32 = arith.constant 0 : i32
    %c0_i32_0 = arith.constant 0 : i32
    %c0_i32_1 = arith.constant 0 : i32
    return %c0_i32, %c0_i32_0 : i32, i32
  }
  func.func @transform_3(%arg0: i32) -> (i32, i32) {
    %c0_i32 = arith.constant 0 : i32
    %c0_i32_0 = arith.constant 0 : i32
    %c0_i32_1 = arith.constant 0 : i32
    return %c0_i32, %c0_i32_0 : i32, i32
  }
  func.func @transform_4(%arg0: i32) -> (i32, i32) {
    %c0_i32 = arith.constant 0 : i32
    %c0_i32_0 = arith.constant 0 : i32
    %c0_i32_1 = arith.constant 0 : i32
    return %c0_i32, %c0_i32_0 : i32, i32
  }
  func.func @transform_5(%arg0: i32) -> (i32, i32) {
    %c0_i32 = arith.constant 0 : i32
    %c0_i32_0 = arith.constant 0 : i32
    return %c0_i32, %arg0 : i32, i32
  }
}

</mosaic_0001>

<bundles_post_ra>
// kernel: tpu_custom_call.1
= control target key start
LH: loop header
LB: loop body
LE: loop exit
PB: predicated region body
PF: predicated region fallthrough
CT: control target
= control target key end

     0   :  { %s736_s0 = inlined_call_operand.vmem [shape: f32[128,20], index: 0, kind: input, shape index: {}]   ;;  %s737_s1 = inlined_call_operand.vmem [shape: f32[20,32], index: 1, kind: input, shape index: {}]   ;;  %s738_s2 = inlined_call_operand.vmem [shape: f32[1,32], index: 2, kind: input, shape index: {}]   ;;  %s739_s3 = inlined_call_operand.vmem [shape: f32[1,32], index: 3, kind: input, shape index: {}]   ;;  %s740_s4 = inlined_call_operand.<no memory space> [shape: f32[1,1], index: 4, kind: input, shape index: {}]   ;;  %s741_s5 = inlined_call_operand.hbm [shape: f32[1,128], index: 5, kind: output, shape index: {}]  }
   0x1   :  { %v10_v0 = vstv %s740_s4 }
   0x2   :  { %11 = vst [vmem:[#allocation2] sm:$0x1] %v10_v0 }
   0x3   :  { %v41_v1 = vld [vmem:[%s737_s1 + $0x10] sm:$0xf]  ;;  %vm98_vm0 = vcmask 1043456   ;;  %v40_v2 = vld [vmem:[%s737_s1 + $0x8] sm:$0xff]  ;;  %vm49_vm1 = vcmask 162816   ;;  %v23_v3 = vld [vmem:[%s736_s0] sm:$0xff] }
   0x4   :  { %482 = vmatprep.subr.msk.mxu0 %vm98_vm0, %v41_v1  ;;  %v39_v4 = vld [vmem:[%s737_s1] sm:$0xff]  ;;  %488 = vmatprep.mubr.msk.f32.mxu0 %vm49_vm1, %v23_v3  ;;  %v24_v5 = vld [vmem:[%s736_s0 + $0x8] sm:$0xff]  ;;  %v25_v6 = vld [vmem:[%s736_s0 + $0x10] sm:$0xff] }
   0x5   :  { %483 = vmatpush3.msk.msra.mxu0 %vm98_vm0, %v41_v1 }
   0x6   :  { %484 = vmatprep.subr.mxu0 %v40_v2 }
   0x7   :  { %485 = vmatpush3.msra.mxu0 %v40_v2 }
   0x8   :  { %486 = vmatprep.subr.mxu0 %v39_v4 }
   0x9   :  { %487 = vmatpush3.msra.mxu0 %v39_v4 }
   0xa   :  { %12 = vsyncpa [#allocation4], 0  ;;  %489 = vmatmul.mubr.msk.f32.vlgmr.msra.gmra.mxu0 %vm49_vm1, %v24_v5  ;;  %v26_v7 = vld [vmem:[%s736_s0 + $0x18] sm:$0xff]  ;;  %v27_v8 = vld [vmem:[%s736_s0 + $0x20] sm:$0xff]  ;;  %v574_v20 = vmov 0.0   ;;  %vm575_vm2 = vmmov 0  }
   0xb   :  { %491 = vmatprep.mubr.msk.f32.mxu0 %vm49_vm1, %v25_v6  ;;  %v28_v9 = vld [vmem:[%s736_s0 + $0x28] sm:$0xff]  ;;  %v29_v10 = vld [vmem:[%s736_s0 + $0x30] sm:$0xff]  ;;  %v30_v11 = vld [vmem:[%s736_s0 + $0x38] sm:$0xff]  ;;  %512 = vmatprep.subr.mxu1 %v574_v20  ;;  %v576_v22 = vmov 0   ;;  %vm274_vm3 = vcmask 261120   ;;  %s577_s6 = smov [#allocation3]  }
   0xc   :  { %v31_v12 = vld [vmem:[%s736_s0 + $0x40] sm:$0xff]  ;;  %v32_v13 = vld [vmem:[%s736_s0 + $0x48] sm:$0xff]  ;;  %v33_v14 = vld [vmem:[%s736_s0 + $0x50] sm:$0xff]  ;;  %544 = vmatprep.mubr.msk.f32.mxu1 %vm575_vm2, %v574_v20  ;;  %551 = vset.pattern.permute.xlu0 %v576_v22  ;;  %s403_s7 = sshll.u32 %s577_s6, 4  ;;  %s404_s7 = int_to_ptr.vmem [resolvable:$true] %s403_s7 }
   0xd   :  { %v34_v15 = vld [vmem:[%s736_s0 + $0x58] sm:$0xff]  ;;  %v35_v16 = vld [vmem:[%s736_s0 + $0x60] sm:$0xff]  ;;  %v36_v17 = vld [vmem:[%s736_s0 + $0x68] sm:$0xff]  ;;  %s552_s8 = scalar_lea.vmem %s404_s7, 16  ;;  %s556_s9 = scalar_lea.vmem %s404_s7, 32 }
   0xe   :  { %492 = vmatmul.mubr.msk.f32.gmra.mxu0 %vm49_vm1, %v26_v7  ;;  %v37_v18 = vld [vmem:[%s736_s0 + $0x70] sm:$0xff]  ;;  %v38_v19 = vld [vmem:[%s736_s0 + $0x78] sm:$0xff]  ;;  %v264_v21 = vld [vmem:[#allocation2] sm:$0x1]  ;;  %p553_p0 = scmp.ne.s32.totalorder %s404_s7, %s552_s8  ;;  %p557_p1 = scmp.lt.s32.totalorder %s404_s7, %s404_s7 }
   0xf   :  { %494 = vmatprep.mubr.msk.f32.mxu0 %vm49_vm1, %v27_v8  ;;  %267 = vperm.xlu0 %551, %v264_v21   ;;  %v411_v37 = vld [vmem:[%s738_s2] ss:$0 sm:$0xff]  ;;  %p558_p2 = scmp.lt.s32.totalorder %s556_s9, %s552_s8 }
  0x10   :  { %v263_v8 = vld [vmem:[%s739_s3] sm:$0x1] }
  0x11   :  { %p559_p3 = por %p558_p2, %p557_p1 }
  0x12   :  { %495 = vmatmul.mubr.msk.f32.gmra.mxu0 %vm49_vm1, %v28_v9  ;;  %v270_v9 = vlaneseq }
  0x13   :  { %497 = vmatprep.mubr.msk.f32.mxu0 %vm49_vm1, %v29_v10  ;;  %p560_p4 = pnand %p559_p3, %p553_p0 }
  0x14   :  { %v271_v10 = vshrl.u32 %v270_v9, 7 }
  0x16   :  { %498 = vmatmul.mubr.msk.f32.gmra.mxu0 %vm49_vm1, %v30_v11  ;;  %v272_v11 = vsub.s32 0, %v271_v10 }
  0x17   :  { %500 = vmatprep.mubr.msk.f32.mxu0 %vm49_vm1, %v31_v12 }
  0x1a   :  { %501 = vmatmul.mubr.msk.f32.gmra.mxu0 %vm49_vm1, %v32_v13 }
  0x1b   :  { %503 = vmatprep.mubr.msk.f32.mxu0 %vm49_vm1, %v33_v14 }
  0x1e   :  { %504 = vmatmul.mubr.msk.f32.gmra.mxu0 %vm49_vm1, %v34_v15 }
  0x1f   :  { %506 = vmatprep.mubr.msk.f32.mxu0 %vm49_vm1, %v35_v16 }
  0x22   :  { %507 = vmatmul.mubr.msk.f32.gmra.mxu0 %vm49_vm1, %v36_v17 }
  0x23   :  { %509 = vmatprep.mubr.msk.f32.mxu0 %vm49_vm1, %v37_v18 }
  0x26   :  { %510 = vmatmul.mubr.msk.f32.gmra.mxu0 %vm49_vm1, %v38_v19 }
  0x8a   :  { %v268_v12 = vpop.permute.xlu0 %267 }
  0x8b   :  { %v273_v13 = vrot.slane %v268_v12, %v272_v11 }
  0xca   :  { %v686_v23 = vpop.f32.mrf.mxu0 }
  0xcb   :  { %v174_v3 = vadd.f32 %v686_v23, %v411_v37 }
  0xcc   :  { %v688_v24 = vpop.f32.mrf.mxu0 }
  0xcd   :  { %v248_v5 = vmax.f32 %v174_v3, 0.0  ;;  %v169_v6 = vadd.f32 %v411_v37, %v688_v24 }
  0xce   :  { %v493_v25 = vpop.f32.mrf.mxu0 }
  0xcf   :  { %v184_v63 = vadd.f32 %v493_v25, %v411_v37  ;;  %v247_v7 = vmax.f32 %v169_v6, 0.0 }
  0xd0   :  { %v690_v26 = vpop.f32.mrf.mxu0 }
  0xd1   :  { %v250_v1 = vmax.f32 %v184_v63, 0.0  ;;  %v179_v2 = vadd.f32 %v411_v37, %v690_v26 }
  0xd2   :  { %v496_v27 = vpop.f32.mrf.mxu0 }
  0xd3   :  { %v194_v59 = vadd.f32 %v496_v27, %v411_v37  ;;  %v249_v4 = vmax.f32 %v179_v2, 0.0 }
  0xd4   :  { %v188_v28 = vpop.f32.mrf.mxu0 }
  0xd5   :  { %v252_v61 = vmax.f32 %v194_v59, 0.0  ;;  %v189_v62 = vadd.f32 %v411_v37, %v188_v28 }
  0xd6   :  { %v499_v29 = vpop.f32.mrf.mxu0 }
  0xd7   :  { %v204_v55 = vadd.f32 %v499_v29, %v411_v37  ;;  %v251_v0 = vmax.f32 %v189_v62, 0.0 }
  0xd8   :  { %v198_v30 = vpop.f32.mrf.mxu0 }
  0xd9   :  { %v254_v57 = vmax.f32 %v204_v55, 0.0  ;;  %v199_v58 = vadd.f32 %v411_v37, %v198_v30 }
  0xda   :  { %v502_v31 = vpop.f32.mrf.mxu0 }
  0xdb   :  { %v214_v51 = vadd.f32 %v502_v31, %v411_v37  ;;  %v253_v60 = vmax.f32 %v199_v58, 0.0 }
  0xdc   :  { %v208_v32 = vpop.f32.mrf.mxu0 }
  0xdd   :  { %v256_v53 = vmax.f32 %v214_v51, 0.0  ;;  %v209_v54 = vadd.f32 %v411_v37, %v208_v32 }
  0xde   :  { %v505_v33 = vpop.f32.mrf.mxu0 }
  0xdf   :  { %v224_v47 = vadd.f32 %v505_v33, %v411_v37  ;;  %v255_v56 = vmax.f32 %v209_v54, 0.0 }
  0xe0   :  { %v218_v34 = vpop.f32.mrf.mxu0 }
  0xe1   :  { %v258_v49 = vmax.f32 %v224_v47, 0.0  ;;  %v219_v50 = vadd.f32 %v411_v37, %v218_v34 }
  0xe2   :  { %v508_v35 = vpop.f32.mrf.mxu0 }
  0xe3   :  { %v234_v43 = vadd.f32 %v508_v35, %v411_v37  ;;  %v257_v52 = vmax.f32 %v219_v50, 0.0 }
  0xe4   :  { %v228_v36 = vpop.f32.mrf.mxu0 }
  0xe5   :  { %v260_v45 = vmax.f32 %v234_v43, 0.0  ;;  %v229_v46 = vadd.f32 %v411_v37, %v228_v36 }
  0xe6   :  { %v511_v38 = vpop.f32.mrf.mxu0 }
  0xe7   :  { %v244_v39 = vadd.f32 %v511_v38, %v411_v37  ;;  %v259_v48 = vmax.f32 %v229_v46, 0.0 }
  0xe8   :  { %v238_v40 = vpop.f32.mrf.mxu0 }
  0xe9   :  { %v262_v41 = vmax.f32 %v244_v39, 0.0  ;;  %v239_v42 = vadd.f32 %v411_v37, %v238_v40 }
  0xeb   :  { %513 = vmatpush3.xpose.msk.msra.mxu1 %vm274_vm3, %v262_v41  ;;  %v261_v44 = vmax.f32 %v239_v42, 0.0 }
  0xec   :  { %514 = vmatprep.subr.mxu1 %v574_v20 }
  0xef   :  { %515 = vmatpush3.xpose.msk.msra.mxu1 %vm274_vm3, %v261_v44 }
  0xf0   :  { %516 = vmatprep.subr.mxu1 %v574_v20 }
  0xf3   :  { %517 = vmatpush3.xpose.msk.msra.mxu1 %vm274_vm3, %v260_v45 }
  0xf4   :  { %518 = vmatprep.subr.mxu1 %v574_v20 }
  0xf7   :  { %519 = vmatpush3.xpose.msk.msra.mxu1 %vm274_vm3, %v259_v48 }
  0xf8   :  { %520 = vmatprep.subr.mxu1 %v574_v20 }
  0xfb   :  { %521 = vmatpush3.xpose.msk.msra.mxu1 %vm274_vm3, %v258_v49 }
  0xfc   :  { %522 = vmatprep.subr.mxu1 %v574_v20 }
  0xff   :  { %523 = vmatpush3.xpose.msk.msra.mxu1 %vm274_vm3, %v257_v52 }
 0x100   :  { %524 = vmatprep.subr.mxu1 %v574_v20 }
 0x103   :  { %525 = vmatpush3.xpose.msk.msra.mxu1 %vm274_vm3, %v256_v53 }
 0x104   :  { %526 = vmatprep.subr.mxu1 %v574_v20 }
 0x107   :  { %527 = vmatpush3.xpose.msk.msra.mxu1 %vm274_vm3, %v255_v56 }
 0x108   :  { %528 = vmatprep.subr.mxu1 %v574_v20 }
 0x10b   :  { %529 = vmatpush3.xpose.msk.msra.mxu1 %vm274_vm3, %v254_v57 }
 0x10c   :  { %530 = vmatprep.subr.mxu1 %v574_v20 }
 0x10f   :  { %531 = vmatpush3.xpose.msk.msra.mxu1 %vm274_vm3, %v253_v60 }
 0x110   :  { %532 = vmatprep.subr.mxu1 %v574_v20 }
 0x113   :  { %533 = vmatpush3.xpose.msk.msra.mxu1 %vm274_vm3, %v252_v61 }
 0x114   :  { %534 = vmatprep.subr.mxu1 %v574_v20 }
 0x117   :  { %535 = vmatpush3.xpose.msk.msra.mxu1 %vm274_vm3, %v251_v0 }
 0x118   :  { %536 = vmatprep.subr.mxu1 %v574_v20 }
 0x11b   :  { %537 = vmatpush3.xpose.msk.msra.mxu1 %vm274_vm3, %v250_v1 }
 0x11c   :  { %538 = vmatprep.subr.mxu1 %v574_v20 }
 0x11f   :  { %539 = vmatpush3.xpose.msk.msra.mxu1 %vm274_vm3, %v249_v4 }
 0x120   :  { %540 = vmatprep.subr.mxu1 %v574_v20 }
 0x123   :  { %541 = vmatpush3.xpose.msk.msra.mxu1 %vm274_vm3, %v248_v5 }
 0x124   :  { %542 = vmatprep.subr.mxu1 %v574_v20 }
 0x127   :  { %543 = vmatpush3.xpose.msk.msra.mxu1 %vm274_vm3, %v247_v7 }
 0x12a   :  { %545 = vmatmul.mubr.msk.f32.vlgmr.msra.gmra.mxu1 %vm274_vm3, %v263_v8 }
 0x1ea   :  { %v392_v14 = vpop.f32.mrf.mxu1 }
 0x1eb   :  { %v393_v15 = vadd.f32 %v392_v14, %v273_v13 }
 0x1ec   :  { %v546_v16 = vpop.f32.mrf.mxu1 }
 0x1ed   :  { %396 = vst [vmem:[#allocation3] sm:$0x1] %v393_v15 }
 0x1ee   :  { %563 = shalt.err (!%p560_p4)
}
 0x1ef   :  { %406 = dma.vmem_to_hbm [thread:$0]  %s404_s7, 16, %s741_s5, [#allocation4]  }
 0x1f0   :  { %572 = dma.done.wait [#allocation4], 16  }
 0x1f1   :  { %573 = vsyncadd [#allocation4], 4294967280 }
 0x1f2   :  { %410 = vsyncpa [#allocation4], 1 }

</bundles_post_ra>
